<compile_context>
chip_gen: v7x
topology: tpu7x:2x2x1
jax: 0.10.0
libtpu: 0.0.40
codegen_flags: <defaults>
</compile_context>

<pallas_src>
from dataclasses import dataclass, field
from typing import Any, Dict, List, Optional

import jax
import jax.numpy as jnp
from jax.experimental import pallas as pl
from jax.experimental.pallas import tpu as pltpu


# ----------------------------------------------------------------------------
# Tiling / VMEM budgeting
# ----------------------------------------------------------------------------
_LANE = 128
_SUBLANE = 8
# Conservative double-buffered VMEM budget that fits every generation
# (v7x has only 64 MiB physical / 32 MiB default scoped VMEM).
_VMEM_BUDGET = 28 * 1024 * 1024
# Scoped VMEM limit requested from Mosaic: above our budget, below v7x physical.
_VMEM_LIMIT = 48 * 1024 * 1024
# Max M/N tile: AI = tm*tn/(tm+tn) = 512 flops/byte at 1024x1024, past the HBM
# ridge on v5e (~240) and v7x (~310) and close to it on v6e (~650).
_MAX_TILE = 1024


def _round_up(x: int, m: int) -> int:
    return ((x + m - 1) // m) * m


def _divisor_tile(full: int, unit: int, cap: int) -> int:
    """Largest multiple of `unit` that divides `full` (itself a multiple of
    `unit`) and is <= cap.  Avoids padding the W / bias operands at call time."""
    if full <= cap:
        return full
    t = (cap // unit) * unit
    while t > unit and full % t != 0:
        t -= unit
    return max(t, unit)


def _tile_footprint(tm: int, tn: int, tk: int, x_bytes: int) -> int:
    # double-buffered x / W / out tiles + (tiny) bias tile
    return 2 * (tm * tk * x_bytes + tk * tn * 2 + tm * tn * 4 + tn * 4)


# ----------------------------------------------------------------------------
# Pallas kernels: the wrapped postproc module's forward (Linear + bias + ReLU)
# ----------------------------------------------------------------------------
def _linear_relu_kernel(x_ref, w_ref, b_ref, o_ref):
    """Single K step: the whole (aligned) K strip is VMEM-resident.
    Computes relu(x @ W + b) for one (tm, tn) output tile.  The f32->bf16 cast
    of x (when x arrives as f32) is fused here so x never takes an extra HBM
    round trip through a standalone XLA convert."""
    acc = jnp.dot(
        x_ref[...].astype(jnp.bfloat16), w_ref[...],
        preferred_element_type=jnp.float32,
    )
    o_ref[...] = jnp.maximum(acc + b_ref[...], 0.0).astype(o_ref.dtype)


def _linear_relu_acc_kernel(x_ref, w_ref, b_ref, o_ref):
    """Large-K path: K reduced along grid axis 2, accumulating directly into
    the resident f32 output tile (no scratch); bias + ReLU fused into the
    k == last epilogue."""
    k = pl.program_id(2)

    @pl.when(k == 0)
    def _():
        o_ref[...] = jnp.zeros_like(o_ref)

    o_ref[...] += jnp.dot(
        x_ref[...].astype(jnp.bfloat16), w_ref[...],
        preferred_element_type=jnp.float32,
    )

    @pl.when(k == pl.num_programs(2) - 1)
    def _():
        o_ref[...] = jnp.maximum(o_ref[...] + b_ref[...], 0.0)


def prepare_linear_params(w: jax.Array, b: jax.Array):
    """One-time parameter prep (module init): cast W to bf16 and pad W / bias
    to lane-aligned (multiple-of-128) shapes so the per-step hot path has no
    recurring cast / pad HBM traffic."""
    K, N = w.shape
    Ka, Na = _round_up(K, _LANE), _round_up(N, _LANE)
    w16 = w.astype(jnp.bfloat16)
    if (Ka, Na) != (K, N):
        w16 = jnp.pad(w16, ((0, Ka - K), (0, Na - N)))
    b32 = jnp.asarray(b, jnp.float32).reshape(1, N)
    if Na != N:
        b32 = jnp.pad(b32, ((0, 0), (0, Na - N)))
    return w16, b32, N


def postproc_linear_relu(x: jax.Array, w16: jax.Array, b32: jax.Array,
                         n_out: int) -> jax.Array:
    """relu(x @ W + b) with pre-prepared (bf16, lane-padded) W and f32 bias.

    x: (M, K) float; w16: (Ka, Na) bf16, Ka = round_up(K, 128), Na = round_up(N, 128);
    b32: (1, Na) f32.  Returns (M, n_out) f32.
    """
    M, K = x.shape
    Ka, Na = w16.shape
    assert Ka == _round_up(K, _LANE), (K, Ka)

    # --- tile selection (lane-dense, per-generation-safe VMEM budget) -------
    Ma = _round_up(M, _SUBLANE)
    tm = Ma if Ma <= _MAX_TILE else 512
    tn = _divisor_tile(Na, _LANE, _MAX_TILE)

    def fits(tm_, tn_, tk_):
        # budget with x at 4 B/elem (worst case: in-kernel cast path keeps f32)
        return _tile_footprint(tm_, tn_, tk_, 4) <= _VMEM_BUDGET

    single_k = fits(tm, tn, Ka)
    if single_k:
        tk = Ka
    else:
        tk = _divisor_tile(Ka, _LANE, 512)
        while not fits(tm, tn, tk) and tn > 256:
            tn = _divisor_tile(Na, _LANE, tn // 2)
        while not fits(tm, tn, tk) and tm > 256:
            tm = _round_up(tm // 2, _SUBLANE)
        while not fits(tm, tn, tk) and tk > _LANE:
            tk = _divisor_tile(Ka, _LANE, tk // 2)

    # v7x has 2 TensorCores: ensure >= 2 parallel grid blocks when the problem
    # is big enough to split the M axis without hurting MXU efficiency.
    if (Ma // tm) * (Na // tn) == 1 and Ma >= 256:
        tm = _round_up((Ma + 1) // 2, _SUBLANE)

    Mp = _round_up(M, tm)
    m_tiles, n_tiles = Mp // tm, Na // tn
    k_tiles = Ka // tk

    # x operand: with a single N block, x is read from HBM exactly once, so we
    # keep it f32 and fuse the bf16 cast inside the kernel (no standalone cast
    # round trip).  With N re-reads, pre-cast once to halve re-read traffic.
    if x.dtype == jnp.bfloat16 or n_tiles == 1:
        x_in = x
    else:
        x_in = x.astype(jnp.bfloat16)

    # Pad x only where needed (zero rows / zero K columns add 0 to the matmul).
    if (Mp, Ka) != (M, K):
        x_in = jnp.pad(x_in, ((0, Mp - M), (0, Ka - K)))

    x_bytes = x_in.dtype.itemsize

    # Advisory cost estimate reflecting actual DMA traffic (incl. re-reads) so
    # XLA overlaps this kernel sensibly with the sparse-dist work around it.
    flops = 2 * Mp * Na * Ka
    if single_k:
        x_b = Mp * Ka * x_bytes
        w_b = Ka * Na * 2 * (m_tiles if n_tiles > 1 else 1)
        b_b = Na * 4 * (m_tiles if n_tiles > 1 else 1)
    else:
        x_b = Mp * Ka * x_bytes * n_tiles
        w_b = Ka * Na * 2 * m_tiles
        b_b = Na * 4 * m_tiles * n_tiles
    cost = pl.CostEstimate(flops=flops, transcendentals=0,
                           bytes_accessed=x_b + w_b + b_b + Mp * Na * 4)

    if single_k:
        # 2D grid, no K loop, no accumulator scratch.  x strip is resident
        # across j; with n_tiles == 1 the W strip is DMA'd exactly once.
        out = pl.pallas_call(
            _linear_relu_kernel,
            out_shape=jax.ShapeDtypeStruct((Mp, Na), jnp.float32),
            grid_spec=pltpu.PrefetchScalarGridSpec(
                num_scalar_prefetch=0,
                grid=(m_tiles, n_tiles),
                in_specs=[
                    pl.BlockSpec((tm, Ka), lambda i, j: (i, 0)),  # x strip
                    pl.BlockSpec((Ka, tn), lambda i, j: (0, j)),  # W strip
                    pl.BlockSpec((1, tn), lambda i, j: (0, j)),   # bias
                ],
                out_specs=pl.BlockSpec((tm, tn), lambda i, j: (i, j)),
            ),
            compiler_params=pltpu.CompilerParams(
                dimension_semantics=("parallel", "parallel"),
                vmem_limit_bytes=_VMEM_LIMIT,
            ),
            cost_estimate=cost,
        )(x_in, w16, b32)
    else:
        # 3D grid, reduction axis last; accumulate into the resident output.
        # (If DMA is still exposed at these tile sizes, pipeline_mode=
        #  pl.Buffered(3) on the x/W specs is the next knob to sweep.)
        out = pl.pallas_call(
            _linear_relu_acc_kernel,
            out_shape=jax.ShapeDtypeStruct((Mp, Na), jnp.float32),
            grid_spec=pltpu.PrefetchScalarGridSpec(
                num_scalar_prefetch=0,
                grid=(m_tiles, n_tiles, k_tiles),
                in_specs=[
                    pl.BlockSpec((tm, tk), lambda i, j, k: (i, k)),  # x tile
                    pl.BlockSpec((tk, tn), lambda i, j, k: (k, j)),  # W tile
                    pl.BlockSpec((1, tn), lambda i, j, k: (0, j)),   # bias
                ],
                out_specs=pl.BlockSpec((tm, tn), lambda i, j, k: (i, j)),
            ),
            compiler_params=pltpu.CompilerParams(
                dimension_semantics=("parallel", "parallel", "arbitrary"),
                vmem_limit_bytes=_VMEM_LIMIT,
            ),
            cost_estimate=cost,
        )(x_in, w16, b32)

    # Only sliced when the logical shape was actually unaligned (no-op in the
    # common lane-/sublane-aligned case, so no extra HBM copy).
    if Mp != M or Na != n_out:
        out = out[:M, :n_out]
    return out


# ----------------------------------------------------------------------------
# Glue: ArgInfo / context / PipelinedPostproc wrapper (no tensor math here)
# ----------------------------------------------------------------------------
@dataclass
class ArgInfo:
    input_attrs: List[str]
    is_getitems: List[bool]
    postproc_modules: List[Optional["PipelinedPostproc"]]
    constants: List[Optional[object]]
    name: Optional[str]


@dataclass
class TrainPipelineContext:
    postproc_fwd_results: Dict[str, Any] = field(default_factory=dict)
    index: Optional[int] = None


class NoOpStream:
    """Streams are a CUDA concept; on TPU this is a no-op context manager."""

    def __init__(self, stream: Optional[object]) -> None:
        self._stream = stream

    def __enter__(self) -> "NoOpStream":
        return self

    def __exit__(self, exc_type, exc_value, traceback) -> None:
        return None


def _build_args_kwargs(initial_input: Any, fwd_args: List[ArgInfo]):
    args = []
    kwargs = {}
    for arg_info in fwd_args:
        if arg_info.input_attrs:
            arg = initial_input
            for attr, is_getitem, postproc_mod, obj in zip(
                arg_info.input_attrs,
                arg_info.is_getitems,
                arg_info.postproc_modules,
                arg_info.constants,
            ):
                if obj is not None:
                    if isinstance(obj, list):
                        arg = [
                            v
                            if not isinstance(v, ArgInfo)
                            else _build_args_kwargs(initial_input, [v])[0][0]
                            for v in obj
                        ]
                    elif isinstance(obj, dict):
                        arg = {
                            k: v
                            if not isinstance(v, ArgInfo)
                            else _build_args_kwargs(initial_input, [v])[0][0]
                            for k, v in obj.items()
                        }
                    else:
                        arg = obj
                    break
                elif postproc_mod is not None:
                    arg = postproc_mod(arg)
                elif is_getitem:
                    arg = arg[attr]
                elif attr != "":
                    arg = getattr(arg, attr)
                else:
                    arg = arg
            if arg_info.name:
                kwargs[arg_info.name] = arg
            else:
                args.append(arg)
        elif arg_info.name:
            kwargs[arg_info.name] = None
        else:
            args.append(None)
    return args, kwargs


class SyntheticPostprocModule:
    """The wrapped postproc module: y = relu(x @ W + b), run in Pallas."""

    def __init__(self, hidden_in: int, hidden_out: int):
        # Deterministic parameter init (synthetic, not a checkpoint load).
        kw, kb = jax.random.split(jax.random.PRNGKey(42))
        scale = 1.0 / jnp.sqrt(jnp.float32(hidden_in))
        self.weight = jax.random.normal(kw, (hidden_in, hidden_out), jnp.float32) * scale
        self.bias = jax.random.normal(kb, (1, hidden_out), jnp.float32) * 0.01
        # Perf: cast + pad the parameters ONCE here so the per-step hot path
        # does no recurring cast/pad HBM round trips.
        self._w16, self._b32, self._n_out = prepare_linear_params(self.weight, self.bias)

    def __call__(self, x: jax.Array) -> jax.Array:
        return postproc_linear_relu(x, self._w16, self._b32, self._n_out)


class PipelinedPostproc:
    """JAX/Pallas equivalent of torchrec's PipelinedPostproc wrapper."""

    def __init__(
        self,
        postproc_module: SyntheticPostprocModule,
        fqn: str,
        args: List[ArgInfo],
        context: TrainPipelineContext,
        default_stream: Optional[object] = None,
        dist_stream: Optional[object] = None,
    ) -> None:
        self._postproc_module = postproc_module
        self._fqn = fqn
        self._args = args
        self._context = context
        self._default_stream = default_stream
        self._dist_stream = dist_stream
        # TODO(synk): CUDA stream contexts / wait_stream / record_stream have no
        # TPU equivalent; data dependencies handle ordering in JAX.
        self._stream_context = NoOpStream

    @property
    def postproc_module(self) -> SyntheticPostprocModule:
        return self._postproc_module

    @property
    def fqn(self) -> str:
        return self._fqn

    @property
    def args(self) -> List[ArgInfo]:
        return self._args

    def set_context(self, context: TrainPipelineContext) -> None:
        self._context = context

    def get_context(self) -> TrainPipelineContext:
        return self._context

    def __call__(self, *input, **kwargs) -> Any:
        # 1. cache hit -> return memoized result
        if self._fqn in self._context.postproc_fwd_results:
            return self._context.postproc_fwd_results[self._fqn]
        # 2. resolve args from the incoming batch via ArgInfo
        args, kw = _build_args_kwargs(input[0], self._args)
        # 3. run the wrapped postproc module (Pallas kernel) under no-op streams
        with self._stream_context(self._dist_stream):
            res = self._postproc_module(*args, **kw)
        with self._stream_context(self._default_stream):
            self._context.postproc_fwd_results[self._fqn] = res
        return res


# ----------------------------------------------------------------------------
# Demo / correctness check
# ----------------------------------------------------------------------------
if __name__ == "__main__":
    # Lane-dense small demo shape: hidden = 128 (multiple of 128 lanes).
    batch, hidden_in, hidden_out = 16, 128, 128

    key = jax.random.PRNGKey(0)
    x = jax.random.normal(key, (batch, hidden_in), jnp.float32)

    # Incoming "batch" object: a dict; the ArgInfo picks out batch["features"].
    initial_input = {"features": x}

    context = TrainPipelineContext(index=0)
    arg_infos = [
        ArgInfo(
            input_attrs=["features"],
            is_getitems=[True],
            postproc_modules=[None],
            constants=[None],
            name=None,
        )
    ]

    postproc = SyntheticPostprocModule(hidden_in, hidden_out)
    pipelined = PipelinedPostproc(
        postproc, fqn="model.postproc", args=arg_infos, context=context
    )

    out = pipelined(initial_input)
    out = jax.block_until_ready(out)

    # second call hits the fqn cache (wrapper semantics)
    out_cached = pipelined(initial_input)
    assert out_cached is out

    # reference checks against plain JAX
    # (a) same-precision reference (bf16 operands, f32 accumulate) -> tight tol
    ref_bf16 = jnp.maximum(
        jnp.dot(
            x.astype(jnp.bfloat16),
            postproc.weight.astype(jnp.bfloat16),
            preferred_element_type=jnp.float32,
        )
        + postproc.bias,
        0.0,
    )
    # (b) full-f32 reference -> loose tol (bf16 quantization of operands)
    ref_f32 = jnp.maximum(x @ postproc.weight + postproc.bias, 0.0)

    assert out.shape == (batch, hidden_out)
    assert jnp.allclose(out, ref_bf16, atol=1e-3, rtol=1e-3)
    assert jnp.allclose(out, ref_f32, atol=5e-2, rtol=5e-2)

    print("KERNEL_OK")
</pallas_src>

<mosaic_0001>
module attributes {stable_mosaic.version = 11 : i64} {
  func.func @_linear_relu_kernel(%arg0: i32, %arg1: i32, %arg2: memref<16x128xf32, #tpu.memory_space<vmem>>, %arg3: memref<128x128xbf16, #tpu.memory_space<vmem>>, %arg4: memref<1x128xf32, #tpu.memory_space<vmem>>, %arg5: memref<16x128xf32, #tpu.memory_space<vmem>>) attributes {dimension_semantics = [#tpu.dimension_semantics<parallel>, #tpu.dimension_semantics<parallel>], iteration_bounds = array<i64: 1, 1>, scalar_prefetch = 0 : i64, scratch_operands = 0 : i64, tpu.core_type = #tpu.core_type<tc>, window_params = [{transform_indices = @transform_0, window_bounds = array<i64: 16, 128>}, {transform_indices = @transform_1, window_bounds = array<i64: 128, 128>}, {transform_indices = @transform_2, window_bounds = array<i64: 1, 128>}, {transform_indices = @transform_3, window_bounds = array<i64: 16, 128>}]} {
    %c0 = arith.constant 0 : index
    %c0_0 = arith.constant 0 : index
    %0 = vector.load %arg2[%c0, %c0_0] : memref<16x128xf32, #tpu.memory_space<vmem>>, vector<16x128xf32>
    %1 = arith.truncf %0 : vector<16x128xf32> to vector<16x128xbf16>
    %c0_1 = arith.constant 0 : index
    %c0_2 = arith.constant 0 : index
    %2 = vector.load %arg3[%c0_1, %c0_2] : memref<128x128xbf16, #tpu.memory_space<vmem>>, vector<128x128xbf16>
    %cst = arith.constant dense<0.000000e+00> : vector<16x128xf32>
    %3 = tpu.matmul %1, %2, %cst {dimension_numbers = #tpu.dot_dimension_numbers<[1], [0], [0], [1], [0, 0, 1, 1], [], []>} : vector<16x128xbf16>, vector<128x128xbf16>, vector<16x128xf32> -> vector<16x128xf32>
    %c0_3 = arith.constant 0 : index
    %c0_4 = arith.constant 0 : index
    %4 = vector.load %arg4[%c0_3, %c0_4] : memref<1x128xf32, #tpu.memory_space<vmem>>, vector<1x128xf32>
    %5 = vector.broadcast %4 : vector<1x128xf32> to vector<16x128xf32>
    %6 = arith.addf %3, %5 : vector<16x128xf32>
    %cst_5 = arith.constant 0.000000e+00 : f32
    %7 = vector.broadcast %cst_5 : f32 to vector<16x128xf32>
    %8 = arith.maximumf %6, %7 : vector<16x128xf32>
    %c0_6 = arith.constant 0 : index
    %c0_7 = arith.constant 0 : index
    %9 = vector.load %arg5[%c0_6, %c0_7] : memref<16x128xf32, #tpu.memory_space<vmem>>, vector<16x128xf32>
    tpu.vector_store %arg5[%c0_6, %c0_7], %8 {strides = array<i32>} : memref<16x128xf32, #tpu.memory_space<vmem>>, vector<16x128xf32>,
    return
  }
  func.func @transform_0(%arg0: i32, %arg1: i32) -> (i32, i32) {
    %c0_i32 = arith.constant 0 : i32
    %c0_i32_0 = arith.constant 0 : i32
    return %arg0, %c0_i32 : i32, i32
  }
  func.func @transform_1(%arg0: i32, %arg1: i32) -> (i32, i32) {
    %c0_i32 = arith.constant 0 : i32
    %c0_i32_0 = arith.constant 0 : i32
    return %c0_i32, %arg1 : i32, i32
  }
  func.func @transform_2(%arg0: i32, %arg1: i32) -> (i32, i32) {
    %c0_i32 = arith.constant 0 : i32
    %c0_i32_0 = arith.constant 0 : i32
    return %c0_i32, %arg1 : i32, i32
  }
  func.func @transform_3(%arg0: i32, %arg1: i32) -> (i32, i32) {
    %c0_i32 = arith.constant 0 : i32
    return %arg0, %arg1 : i32, i32
  }
}

</mosaic_0001>

<bundles_post_ra>
// kernel: tpu_custom_call.1
= control target key start
LH: loop header
LB: loop body
LE: loop exit
PB: predicated region body
PF: predicated region fallthrough
CT: control target
= control target key end

     0   :  { %8 = vsyncpa [#allocation3], 0  ;;  %s382_s0 = inlined_call_operand.hbm [shape: f32[16,128], index: 0, kind: input, shape index: {}]   ;;  %s383_s1 = inlined_call_operand.hbm [shape: bf16[128,128], index: 1, kind: input, shape index: {}]   ;;  %s384_s2 = inlined_call_operand.vmem [shape: f32[1,128], index: 2, kind: input, shape index: {}]   ;;  %s385_s3 = inlined_call_operand.hbm [shape: f32[16,128], index: 3, kind: output, shape index: {}]  }
   0x1   :  { %9 = vsyncpa [#allocation6], 0 }
   0x2   :  { %10 = vsyncpa [#allocation4], 0  ;;  %s308_s12 = smov [#allocation2]   ;;  %s236_s16 = scalar_lea.hbm %s382_s0, 256 }
   0x3   :  { %s16_s13 = sshll.u32 %s308_s12, 4  ;;  %p237_p0 = scmp.ne.s32.totalorder %s382_s0, %s236_s16  ;;  %s17_s13 = int_to_ptr.vmem [resolvable:$true] %s16_s13 }
   0x4   :  { %p240_p1 = scmp.lt.u32.totalorder %s236_s16, %s382_s0 }
   0x6   :  { %p242_p2 = pnand %p240_p1, %p237_p0 }
   0x8   :  { %245 = shalt.err (!%p242_p2)
}
   0x9   :  { %s246_s21 = scalar_lea.vmem %s17_s13, 256  ;;  %p251_p4 = scmp.lt.s32.totalorder %s17_s13, %s17_s13 }
   0xa   :  { %p247_p3 = scmp.ne.s32.totalorder %s17_s13, %s246_s21  ;;  %p252_p5 = scmp.lt.s32.totalorder %s246_s21, %s246_s21 }
   0xc   :  { %p253_p6 = por %p252_p5, %p251_p4 }
   0xe   :  { %p254_p7 = pnand %p253_p6, %p247_p3 }
  0x10   :  { %257 = shalt.err (!%p254_p7)
}
  0x11   :  { %s309_s22 = smov 128   ;;  %s310_s23 = smov 8  }
  0x12   :  { %22 = dma.hbm_to_vmem [thread:$0]  %s382_s0, 256, %s17_s13, [#allocation3], %s309_s22, %s309_s22, %s310_s23  }
  0x13   :  { %s311_s26 = smov [#allocation5]   ;;  %s258_s30 = scalar_lea.hbm %s383_s1, 1024 }
  0x14   :  { %s28_s27 = sshll.u32 %s311_s26, 4  ;;  %p259_p8 = scmp.ne.s32.totalorder %s383_s1, %s258_s30  ;;  %s29_s27 = int_to_ptr.vmem [resolvable:$true] %s28_s27 }
  0x15   :  { %p262_p9 = scmp.lt.u32.totalorder %s258_s30, %s383_s1 }
  0x17   :  { %p264_p10 = pnand %p262_p9, %p259_p8 }
  0x19   :  { %267 = shalt.err (!%p264_p10)
}
  0x1a   :  { %s268_s8 = scalar_lea.vmem %s29_s27, 1024  ;;  %p273_p12 = scmp.lt.s32.totalorder %s29_s27, %s29_s27 }
  0x1b   :  { %p269_p11 = scmp.ne.s32.totalorder %s29_s27, %s268_s8  ;;  %p274_p13 = scmp.lt.s32.totalorder %s268_s8, %s268_s8 }
  0x1d   :  { %p275_p0 = por %p274_p13, %p273_p12 }
  0x1f   :  { %p276_p1 = pnand %p275_p0, %p269_p11 }
  0x21   :  { %279 = shalt.err (!%p276_p1)
}
  0x22   :  { %s312_s0 = smov 64   ;;  %s313_s9 = smov 4  }
  0x23   :  { %34 = dma.hbm_to_vmem [thread:$0]  %s383_s1, 1024, %s29_s27, [#allocation6], %s312_s0, %s312_s0, %s313_s9  }
  0x24   :  { %302 = dma.done.wait [#allocation3], 256  }
  0x25   :  { %303 = vsyncadd [#allocation3], 4294967040 }
  0x26   :  { %304 = dma.done.wait [#allocation6], 1024  }
  0x27   :  { %305 = vsyncadd [#allocation6], 4294966272  ;;  %v314_v0 = vmov 0.0   ;;  %vm315_vm0 = vmmov 0   ;;  %v228_v1 = vld [vmem:[#allocation5] sm:$0xff]   ;;  %v229_v2 = vld [vmem:[#allocation5 + $0x8] sm:$0xff]  }
  0x28   :  { %199 = vmatprep.subr.bf16.mxu0 %v314_v0  ;;  %215 = vmatprep.mubr.msk.bf16.mxu0 %vm315_vm0, %v314_v0  ;;  %v230_v3 = vld [vmem:[#allocation5 + $0x10] sm:$0xff]   ;;  %v231_v4 = vld [vmem:[#allocation5 + $0x18] sm:$0xff]   ;;  %v232_v5 = vld [vmem:[#allocation5 + $0x20] sm:$0xff]   ;;  %s316_s13 = smov [#allocation7]  }
  0x29   :  { %200 = vmatpush3.bf16.msra.mxu0 %v228_v1  ;;  %v233_v6 = vld [vmem:[#allocation5 + $0x28] sm:$0xff]   ;;  %v234_v7 = vld [vmem:[#allocation5 + $0x30] sm:$0xff]   ;;  %v235_v8 = vld [vmem:[#allocation5 + $0x38] sm:$0xff]   ;;  %s168_s14 = sshll.u32 %s316_s13, 4  ;;  %s169_s14 = int_to_ptr.vmem [resolvable:$true] %s168_s14 }
  0x2a   :  { %201 = vmatprep.subr.bf16.mxu0 %v314_v0  ;;  %v44_v9 = vld [vmem:[#allocation2] sm:$0xff]  ;;  %v45_v10 = vld [vmem:[#allocation2 + $0x8] sm:$0xff]  ;;  %s280_s15 = scalar_lea.vmem %s169_s14, 256  ;;  %p285_p3 = scmp.lt.s32.totalorder %s169_s14, %s169_s14 }
  0x2b   :  { %v46_v11 = vpack.c.bf16 %v45_v10, %v44_v9  ;;  %v181_v12 = vld [vmem:[%s384_s2] ss:$0 sm:$0xff]  ;;  %p281_p2 = scmp.ne.s32.totalorder %s169_s14, %s280_s15  ;;  %p286_p4 = scmp.lt.s32.totalorder %s280_s15, %s280_s15 }
  0x2d   :  { %202 = vmatpush3.bf16.msra.mxu0 %v229_v2  ;;  %p287_p5 = por %p286_p4, %p285_p3 }
  0x2e   :  { %203 = vmatprep.subr.bf16.mxu0 %v314_v0 }
  0x2f   :  { %p288_p6 = pnand %p287_p5, %p281_p2 }
  0x31   :  { %204 = vmatpush3.bf16.msra.mxu0 %v230_v3 }
  0x32   :  { %205 = vmatprep.subr.bf16.mxu0 %v314_v0 }
  0x35   :  { %206 = vmatpush3.bf16.msra.mxu0 %v231_v4 }
  0x36   :  { %207 = vmatprep.subr.bf16.mxu0 %v314_v0 }
  0x39   :  { %208 = vmatpush3.bf16.msra.mxu0 %v232_v5 }
  0x3a   :  { %209 = vmatprep.subr.bf16.mxu0 %v314_v0 }
  0x3d   :  { %210 = vmatpush3.bf16.msra.mxu0 %v233_v6 }
  0x3e   :  { %211 = vmatprep.subr.bf16.mxu0 %v314_v0 }
  0x41   :  { %212 = vmatpush3.bf16.msra.mxu0 %v234_v7 }
  0x42   :  { %213 = vmatprep.subr.bf16.mxu0 %v314_v0 }
  0x45   :  { %214 = vmatpush3.bf16.msra.mxu0 %v235_v8 }
  0x48   :  { %216 = vmatmul.mubr.bf16.vlgmr.msra.gmra.mrb[0].mxu0 %v46_v11 }
 0x11b   :  { %v152_v13 = vpop.f32.mrb[0].mxu0 }
 0x11c   :  { %v153_v14 = vadd.f32 %v181_v12, %v152_v13  ;;  %v217_v15 = vpop.f32.mrb[1].mxu0 }
 0x11d   :  { %v155_v16 = vpop.f32.mrb[2].mxu0 }
 0x11e   :  { %v159_v17 = vmax.f32 %v153_v14, 0.0  ;;  %v156_v18 = vadd.f32 %v181_v12, %v155_v16  ;;  %v218_v19 = vpop.f32.mrb[3].mxu0 }
 0x120   :  { %161 = vst [vmem:[#allocation7] sm:$0xff] %v159_v17  ;;  %v160_v20 = vmax.f32 %v156_v18, 0.0 }
 0x122   :  { %162 = vst [vmem:[#allocation7 + $0x8] sm:$0xff] %v160_v20 }
 0x123   :  { %291 = shalt.err (!%p288_p6)
}
 0x124   :  { %s292_s17 = scalar_lea.hbm %s385_s3, 256 }
 0x125   :  { %p293_p7 = scmp.ne.s32.totalorder %s385_s3, %s292_s17  ;;  %p296_p8 = scmp.lt.u32.totalorder %s292_s17, %s385_s3 }
 0x127   :  { %p298_p9 = pnand %p296_p8, %p293_p7 }
 0x129   :  { %301 = shalt.err (!%p298_p9)
}
 0x12a   :  { %174 = dma.vmem_to_hbm [thread:$0]  %s169_s14, 256, %s385_s3, [#allocation4], %s309_s22, %s309_s22, %s310_s23  }
 0x12b   :  { %306 = dma.done.wait [#allocation4], 256  }
 0x12c   :  { %307 = vsyncadd [#allocation4], 4294967040 }
 0x12d   :  { %178 = vsyncpa [#allocation3], 1 }
 0x12e   :  { %179 = vsyncpa [#allocation6], 1 }
 0x12f   :  { %180 = vsyncpa [#allocation4], 1 }

</bundles_post_ra>
